<compile_context>
chip_gen: v6e
topology: v6e:2x2x1
jax: 0.10.0
libtpu: 0.0.40
codegen_flags: <defaults>
</compile_context>

<pallas_src>
import math

import numpy as np

import jax
import jax.numpy as jnp
from jax.experimental import pallas as pl
from jax.experimental.pallas import tpu as pltpu


# ----------------------------- kernel ---------------------------------------
def hadl_kernel(x_ref, wt_ref, bias_ref, out_ref):
    # x_ref    : [L, TN]   columns = flattened (batch, channel)
    # wt_ref   : [P, L]    folded transform (mean/Haar/DCT/lowrank/iDCT/mean)
    # bias_ref : [P, 1]    folded bias (broadcast over all columns)
    # out_ref  : [P, TN]
    y = jnp.dot(wt_ref[...], x_ref[...], preferred_element_type=jnp.float32)
    out_ref[...] = (y + bias_ref[...]).astype(out_ref.dtype)


# ----------------------------- transform matrices (host, float64) -----------
def haar_lowpass_matrix(seq_len: int) -> np.ndarray:
    """[L, in_len]: y[c] = (x[2c] + x[2c+1]) / sqrt(2); zero-pad if L odd."""
    in_len = seq_len // 2 + 1 if seq_len % 2 != 0 else seq_len // 2
    r = np.arange(seq_len)[:, None]
    c = np.arange(in_len)[None, :]
    return np.where(r // 2 == c, 1.0 / math.sqrt(2.0), 0.0).astype(np.float64)


def dct2_ortho_matrix(n_len: int) -> np.ndarray:
    """[N, N] such that (x @ M) == scipy.fft.dct(x, type=2, norm='ortho')."""
    n = np.arange(n_len)[:, None].astype(np.float64)
    k = np.arange(n_len)[None, :].astype(np.float64)
    m = np.cos(np.pi * (2.0 * n + 1.0) * k / (2.0 * n_len))
    scale = np.where(k == 0, np.sqrt(1.0 / n_len), np.sqrt(2.0 / n_len))
    return m * scale


def idct2_backward_matrix(n_len: int) -> np.ndarray:
    """[N, N] such that (x @ M) == scipy.fft.idct(x, type=2, norm=None)."""
    k = np.arange(n_len)[:, None].astype(np.float64)
    n = np.arange(n_len)[None, :].astype(np.float64)
    m = np.cos(np.pi * k * (2.0 * n + 1.0) / (2.0 * n_len))
    c = np.where(k == 0, 0.5, 1.0)
    return m * c / n_len


# ----------------------------- offline weight folding (float64) -------------
def build_folded_weights(seq_len: int, pred_len: int, a_m, b_m, bias_m):
    """Fold mean-center/Haar/DCT/lowrank/iDCT/mean-restore into (Wt, bias)."""
    a64 = np.asarray(a_m, np.float64)
    b64 = np.asarray(b_m, np.float64)
    bias64 = np.asarray(bias_m, np.float64).reshape(1, pred_len)
    in_len = seq_len // 2 + 1 if seq_len % 2 != 0 else seq_len // 2

    haar = haar_lowpass_matrix(seq_len)                    # [L, in_len]
    dct = dct2_ortho_matrix(in_len) / in_len               # DCT + 1/in_len
    idct = idct2_backward_matrix(pred_len)                 # [P, P]

    w = haar @ dct @ a64 @ b64 @ idct                      # [L, P]

    # Fold mean-center (x - m) and mean-restore (+ m), m = x @ 1_L / L:
    #   out = (x - m 1_L^T) @ W + bias' + m 1_P^T
    #       = x @ [ (I - 1_L 1_L^T / L) @ W + 1_L 1_P^T / L ] + bias'
    w = w - w.mean(axis=0, keepdims=True) + 1.0 / seq_len  # [L, P]

    bias2 = (bias64 @ idct).reshape(pred_len, 1)           # [P, 1]
    return (jnp.asarray(w.T, jnp.float32),                 # Wt: [P, L]
            jnp.asarray(bias2, jnp.float32))


# ----------------------------- tiling heuristic ------------------------------
def _pick_tile_n(n_cols: int, seq_len: int, pred_len: int, itemsize: int) -> int:
    """Lane tile over the flattened batch*channel axis."""
    if n_cols <= 1024:
        # Single full-extent block (satisfies the (8,128) rule by equalling
        # the full array dim); the whole problem is tiny anyway.
        return n_cols
    # Lane-aligned tile: >=512 lanes keeps the 256-wide MXU (v6e/v7x) and all
    # four 128x128 MXUs (v5e) fed, while double-buffered x/out tiles plus the
    # single-buffered Wt stay inside a conservative VMEM working budget and
    # the grid keeps >=4 steps for pipeline steady state.
    budget = 24 << 20
    wt_bytes = pred_len * seq_len * 4
    per_col = 2 * (seq_len + pred_len) * itemsize
    vmem_cap = max(128, ((budget - wt_bytes) // per_col) // 128 * 128)
    steps_cap = max(128, (pl.cdiv(n_cols, 4) // 128) * 128)
    tn = max(512, min(vmem_cap, steps_cap))
    return min(tn, n_cols)


# ----------------------------- wrapper ---------------------------------------
def hadl_forward(x, wt, bias2, *, tn=None, single_buffer_weights=True):
    """x: [B, L, C] -> [B, P, C] (PyTorch HADL Model.forward semantics)."""
    batch, seq_len, channels = x.shape
    pred_len = wt.shape[0]
    n_cols = batch * channels
    itemsize = jnp.dtype(x.dtype).itemsize

    if tn is None:
        tn = _pick_tile_n(n_cols, seq_len, pred_len, itemsize)
    grid = (pl.cdiv(n_cols, tn),)

    # [B, L, C] -> [L, B*C]: put batch*channel on the MXU lane (N) axis so
    # each grid step is one lane-dense matmul with lane-dense stores.
    x2d = jnp.transpose(x, (1, 0, 2)).reshape(seq_len, n_cols)

    if single_buffer_weights:
        # Constant-index weight/bias blocks: no double-buffering needed.
        wt_spec = pl.BlockSpec((pred_len, seq_len), lambda i: (0, 0),
                               pipeline_mode=pl.Buffered(1))
        bias_spec = pl.BlockSpec((pred_len, 1), lambda i: (0, 0),
                                 pipeline_mode=pl.Buffered(1))
    else:
        wt_spec = pl.BlockSpec((pred_len, seq_len), lambda i: (0, 0))
        bias_spec = pl.BlockSpec((pred_len, 1), lambda i: (0, 0))

    flops = 2 * pred_len * seq_len * n_cols + pred_len * n_cols
    bytes_accessed = itemsize * (seq_len * n_cols + pred_len * n_cols) \
        + 4 * (pred_len * seq_len + pred_len)
    vmem_need = 4 * (pred_len * seq_len + pred_len) \
        + 2 * (seq_len + pred_len) * tn * itemsize
    vmem_limit = int(min(max(vmem_need + (4 << 20), 32 << 20), 48 << 20))

    out2d = pl.pallas_call(
        hadl_kernel,
        out_shape=jax.ShapeDtypeStruct((pred_len, n_cols), x.dtype),
        grid_spec=pltpu.PrefetchScalarGridSpec(
            num_scalar_prefetch=0,
            grid=grid,
            in_specs=[
                pl.BlockSpec((seq_len, tn), lambda i: (0, i)),
                wt_spec,
                bias_spec,
            ],
            out_specs=pl.BlockSpec((pred_len, tn), lambda i: (0, i)),
        ),
        compiler_params=pltpu.CompilerParams(
            dimension_semantics=("parallel",),
            vmem_limit_bytes=vmem_limit),
        cost_estimate=pl.CostEstimate(flops=flops, transcendentals=0,
                                      bytes_accessed=bytes_accessed),
    )(x2d, wt, bias2)

    # [P, B*C] -> [B, P, C]
    return jnp.transpose(out2d.reshape(pred_len, batch, channels), (1, 0, 2))


# ----------------------------- pure-JAX reference ----------------------------
def hadl_reference(x, a_m, b_m, bias_m, pred_len):
    """Unfused chain mirroring the PyTorch Model.forward (for validation)."""
    hp = jax.lax.Precision.HIGHEST
    batch, seq_len, channels = x.shape
    in_len = seq_len // 2 + 1 if seq_len % 2 != 0 else seq_len // 2

    haar = jnp.asarray(haar_lowpass_matrix(seq_len), jnp.float32)
    dctm = jnp.asarray(dct2_ortho_matrix(in_len), jnp.float32)
    idctm = jnp.asarray(idct2_backward_matrix(pred_len), jnp.float32)

    xc = jnp.transpose(x, (0, 2, 1))                       # [B, C, L]
    seq_mean = jnp.mean(xc, axis=-1, keepdims=True)
    xc = xc - seq_mean
    h = jnp.einsum('bcl,ln->bcn', xc, haar, precision=hp)
    d = jnp.einsum('bcn,nm->bcm', h, dctm, precision=hp) / in_len
    z = jnp.einsum('bcm,mr->bcr', d, a_m, precision=hp)
    z = jnp.einsum('bcr,rp->bcp', z, b_m, precision=hp) + bias_m
    o = jnp.einsum('bcp,pq->bcq', z, idctm, precision=hp) + seq_mean
    return jnp.transpose(o, (0, 2, 1))                     # [B, P, C]


# ----------------------------- main ------------------------------------------
if __name__ == "__main__":
    batch = 2
    seq_len = 16
    channels = 4
    pred_len = 8
    rank = 4

    in_len = seq_len // 2 + 1 if seq_len % 2 != 0 else seq_len // 2

    key = jax.random.PRNGKey(0)
    k_x, k_a, k_b, k_bias = jax.random.split(key, 4)

    # Input [Batch, Input length, Channel]
    x = jax.random.normal(k_x, (batch, seq_len, channels), dtype=jnp.float32)

    # LowRank params, PyTorch-style deterministic init:
    #   kaiming_uniform_ (a=0): bound = sqrt(6 / fan_in), fan_in = size(1)
    bound_a = math.sqrt(6.0 / rank)
    a_m = jax.random.uniform(k_a, (in_len, rank), jnp.float32,
                             minval=-bound_a, maxval=bound_a)
    bound_b = math.sqrt(6.0 / pred_len)
    b_m = jax.random.uniform(k_b, (rank, pred_len), jnp.float32,
                             minval=-bound_b, maxval=bound_b)
    bias_m = jax.random.uniform(k_bias, (1, pred_len), jnp.float32,
                                minval=0.0, maxval=1.0)  # nn.init.uniform_

    wt, bias2 = build_folded_weights(seq_len, pred_len,
                                     np.asarray(a_m), np.asarray(b_m),
                                     np.asarray(bias_m))

    try:
        out = jax.block_until_ready(hadl_forward(x, wt, bias2))
    except Exception:
        # Fallback for JAX versions where single-buffering constant-index
        # weight blocks via pl.Buffered(1) is not supported.
        out = jax.block_until_ready(
            hadl_forward(x, wt, bias2, single_buffer_weights=False))

    assert out.shape == (batch, pred_len, channels), out.shape
    assert bool(jnp.all(jnp.isfinite(out)))

    # Folding changes the f32 rounding order (folded in f64 on host); compare
    # against the unfused reference chain with a bug-catching tolerance.
    ref = hadl_reference(x, a_m, b_m, bias_m, pred_len)
    max_err = float(jnp.max(jnp.abs(out - ref)))
    assert jnp.allclose(out, ref, rtol=1e-2, atol=1e-2), max_err

    print("KERNEL_OK")
</pallas_src>

<mosaic_0001>
module attributes {stable_mosaic.version = 11 : i64} {
  func.func @hadl_kernel(%arg0: i32, %arg1: memref<16x8xf32, #tpu.memory_space<vmem>>, %arg2: memref<8x16xf32, #tpu.memory_space<vmem>>, %arg3: memref<8x1xf32, #tpu.memory_space<vmem>>, %arg4: memref<8x8xf32, #tpu.memory_space<vmem>>) attributes {dimension_semantics = [#tpu.dimension_semantics<parallel>], iteration_bounds = array<i64: 1>, scalar_prefetch = 0 : i64, scratch_operands = 0 : i64, tpu.core_type = #tpu.core_type<tc>, window_params = [{transform_indices = @transform_0, window_bounds = array<i64: 16, 8>}, {pipeline_mode = #tpu.pipeline_mode<synchronous>, transform_indices = @transform_1, window_bounds = array<i64: 8, 16>}, {pipeline_mode = #tpu.pipeline_mode<synchronous>, transform_indices = @transform_2, window_bounds = array<i64: 8, 1>}, {transform_indices = @transform_3, window_bounds = array<i64: 8, 8>}]} {
    %c0 = arith.constant 0 : index
    %c0_0 = arith.constant 0 : index
    %0 = vector.load %arg2[%c0, %c0_0] : memref<8x16xf32, #tpu.memory_space<vmem>>, vector<8x16xf32>
    %c0_1 = arith.constant 0 : index
    %c0_2 = arith.constant 0 : index
    %1 = vector.load %arg1[%c0_1, %c0_2] : memref<16x8xf32, #tpu.memory_space<vmem>>, vector<16x8xf32>
    %cst = arith.constant dense<0.000000e+00> : vector<8x8xf32>
    %2 = tpu.matmul %0, %1, %cst {dimension_numbers = #tpu.dot_dimension_numbers<[1], [0], [0], [1], [0, 0, 1, 1], [], []>} : vector<8x16xf32>, vector<16x8xf32>, vector<8x8xf32> -> vector<8x8xf32>
    %c0_3 = arith.constant 0 : index
    %c0_4 = arith.constant 0 : index
    %3 = vector.load %arg3[%c0_3, %c0_4] : memref<8x1xf32, #tpu.memory_space<vmem>>, vector<8x1xf32>
    %4 = vector.broadcast %3 : vector<8x1xf32> to vector<8x8xf32>
    %5 = arith.addf %2, %4 : vector<8x8xf32>
    %c0_5 = arith.constant 0 : index
    %c0_6 = arith.constant 0 : index
    %6 = vector.load %arg4[%c0_5, %c0_6] : memref<8x8xf32, #tpu.memory_space<vmem>>, vector<8x8xf32>
    tpu.vector_store %arg4[%c0_5, %c0_6], %5 {strides = array<i32>} : memref<8x8xf32, #tpu.memory_space<vmem>>, vector<8x8xf32>,
    return
  }
  func.func @transform_0(%arg0: i32) -> (i32, i32) {
    %c0_i32 = arith.constant 0 : i32
    %c0_i32_0 = arith.constant 0 : i32
    return %c0_i32, %arg0 : i32, i32
  }
  func.func @transform_1(%arg0: i32) -> (i32, i32) {
    %c0_i32 = arith.constant 0 : i32
    %c0_i32_0 = arith.constant 0 : i32
    %c0_i32_1 = arith.constant 0 : i32
    return %c0_i32, %c0_i32_0 : i32, i32
  }
  func.func @transform_2(%arg0: i32) -> (i32, i32) {
    %c0_i32 = arith.constant 0 : i32
    %c0_i32_0 = arith.constant 0 : i32
    %c0_i32_1 = arith.constant 0 : i32
    return %c0_i32, %c0_i32_0 : i32, i32
  }
  func.func @transform_3(%arg0: i32) -> (i32, i32) {
    %c0_i32 = arith.constant 0 : i32
    %c0_i32_0 = arith.constant 0 : i32
    return %c0_i32, %arg0 : i32, i32
  }
}

module attributes {stable_mosaic.version = 11 : i64} {
  func.func @hadl_kernel(%arg0: i32, %arg1: memref<16x8xf32, #tpu.memory_space<vmem>>, %arg2: memref<8x16xf32, #tpu.memory_space<vmem>>, %arg3: memref<8x1xf32, #tpu.memory_space<vmem>>, %arg4: memref<8x8xf32, #tpu.memory_space<vmem>>) attributes {dimension_semantics = [#tpu.dimension_semantics<parallel>], iteration_bounds = array<i64: 1>, scalar_prefetch = 0 : i64, scratch_operands = 0 : i64, tpu.core_type = #tpu.core_type<tc>, window_params = [{transform_indices = @transform_0, window_bounds = array<i64: 16, 8>}, {pipeline_mode = #tpu.pipeline_mode<synchronous>, transform_indices = @transform_1, window_bounds = array<i64: 8, 16>}, {pipeline_mode = #tpu.pipeline_mode<synchronous>, transform_indices = @transform_2, window_bounds = array<i64: 8, 1>}, {transform_indices = @transform_3, window_bounds = array<i64: 8, 8>}]} {
    %c0 = arith.constant 0 : index
    %c0_0 = arith.constant 0 : index
    %0 = vector.load %arg2[%c0, %c0_0] : memref<8x16xf32, #tpu.memory_space<vmem>>, vector<8x16xf32>
    %c0_1 = arith.constant 0 : index
    %c0_2 = arith.constant 0 : index
    %1 = vector.load %arg1[%c0_1, %c0_2] : memref<16x8xf32, #tpu.memory_space<vmem>>, vector<16x8xf32>
    %cst = arith.constant dense<0.000000e+00> : vector<8x8xf32>
    %2 = tpu.matmul %0, %1, %cst {dimension_numbers = #tpu.dot_dimension_numbers<[1], [0], [0], [1], [0, 0, 1, 1], [], []>} : vector<8x16xf32>, vector<16x8xf32>, vector<8x8xf32> -> vector<8x8xf32>
    %c0_3 = arith.constant 0 : index
    %c0_4 = arith.constant 0 : index
    %3 = vector.load %arg3[%c0_3, %c0_4] : memref<8x1xf32, #tpu.memory_space<vmem>>, vector<8x1xf32>
    %4 = vector.broadcast %3 : vector<8x1xf32> to vector<8x8xf32>
    %5 = arith.addf %2, %4 : vector<8x8xf32>
    %c0_5 = arith.constant 0 : index
    %c0_6 = arith.constant 0 : index
    %6 = vector.load %arg4[%c0_5, %c0_6] : memref<8x8xf32, #tpu.memory_space<vmem>>, vector<8x8xf32>
    tpu.vector_store %arg4[%c0_5, %c0_6], %5 {strides = array<i32>} : memref<8x8xf32, #tpu.memory_space<vmem>>, vector<8x8xf32>,
    return
  }
  func.func @transform_0(%arg0: i32) -> (i32, i32) {
    %c0_i32 = arith.constant 0 : i32
    %c0_i32_0 = arith.constant 0 : i32
    return %c0_i32, %arg0 : i32, i32
  }
  func.func @transform_1(%arg0: i32) -> (i32, i32) {
    %c0_i32 = arith.constant 0 : i32
    %c0_i32_0 = arith.constant 0 : i32
    %c0_i32_1 = arith.constant 0 : i32
    return %c0_i32, %c0_i32_0 : i32, i32
  }
  func.func @transform_2(%arg0: i32) -> (i32, i32) {
    %c0_i32 = arith.constant 0 : i32
    %c0_i32_0 = arith.constant 0 : i32
    %c0_i32_1 = arith.constant 0 : i32
    return %c0_i32, %c0_i32_0 : i32, i32
  }
  func.func @transform_3(%arg0: i32) -> (i32, i32) {
    %c0_i32 = arith.constant 0 : i32
    %c0_i32_0 = arith.constant 0 : i32
    return %c0_i32, %arg0 : i32, i32
  }
}

</mosaic_0001>

<bundles_post_ra>
// kernel: tpu_custom_call.1
= control target key start
LH: loop header
LB: loop body
LE: loop exit
PB: predicated region body
PF: predicated region fallthrough
CT: control target
= control target key end

     0   :  { %v152_v1 = vmov 0.0   ;;  %vm153_vm0 = vmmov 0   ;;  %s191_s0 = inlined_call_operand.vmem [shape: f32[16,8], index: 0, kind: input, shape index: {}]   ;;  %s192_s1 = inlined_call_operand.vmem [shape: f32[8,16], index: 1, kind: input, shape index: {}]   ;;  %s193_s2 = inlined_call_operand.vmem [shape: f32[8,1], index: 2, kind: input, shape index: {}]   ;;  %s194_s3 = inlined_call_operand.hbm [shape: f32[8,8], index: 3, kind: output, shape index: {}]  }
   0x1   :  { %v17_v0 = vld [vmem:[%s191_s0 + $0x8] sm:$0xff]  ;;  %118 = vmatprep.subr.mxu0 %v152_v1  ;;  %v16_v2 = vld [vmem:[%s191_s0] sm:$0xff]  ;;  %122 = vmatprep.mubr.msk.f32.mxu0 %vm153_vm0, %v152_v1 }
   0x2   :  { %v18_v3 = vld [vmem:[%s193_s2] sm:$0xff] }
   0x3   :  { %8 = vsyncpa [#allocation3], 0  ;;  %119 = vmatpush3.msra.mxu0 %v17_v0  ;;  %v15_v4 = vld [vmem:[%s192_s1] sm:$0xff]  ;;  %vm24_vm1 = vcmask 130048   ;;  %v154_v5 = vmov 0   ;;  %s155_s0 = smov [#allocation2]  }
   0x4   :  { %129 = vset.pattern.permute.xlu0 %v154_v5  ;;  %120 = vmatprep.subr.mxu0 %v152_v1  ;;  %s106_s20 = sshll.u32 %s155_s0, 4  ;;  %vm98_vm2 = vcmask 64512   ;;  %s107_s20 = int_to_ptr.vmem [resolvable:$true] %s106_s20 }
   0x5   :  { %21 = vperm.xlu0 %129, %v18_v3   ;;  %121 = vmatpush3.msra.mxu0 %v16_v2  ;;  %s130_s2 = scalar_lea.vmem %s107_s20, 128  ;;  %p135_p1 = scmp.lt.s32.totalorder %s107_s20, %s107_s20 }
   0x6   :  { %123 = vmatmul.mubr.msk.f32.vlgmr.msra.gmra.mxu0 %vm24_vm1, %v15_v4  ;;  %p131_p0 = scmp.ne.s32.totalorder %s107_s20, %s130_s2  ;;  %p136_p2 = scmp.lt.s32.totalorder %s130_s2, %s130_s2 }
   0x8   :  { %p137_p3 = por %p136_p2, %p135_p1 }
   0xa   :  { %p138_p4 = pnand %p137_p3, %p131_p0 }
  0x80   :  { %v22_v6 = vpop.permute.xlu0 %21 }
  0xc6   :  { %v94_v7 = vpop.f32.mrf.mxu0 }
  0xc7   :  { %v95_v8 = vadd.f32 %v94_v7, %v22_v6 }
  0xc8   :  { %v124_v9 = vpop.f32.mrf.mxu0 }
  0xc9   :  { %99 = vst.msk [vmem:[#allocation2] sm:$0xff] %vm98_vm2, %v95_v8 }
  0xca   :  { %141 = shalt.err (!%p138_p4)
}
  0xcb   :  { %109 = dma.vmem_to_hbm [thread:$0]  %s107_s20, 128, %s194_s3, [#allocation3]  }
  0xcc   :  { %150 = dma.done.wait [#allocation3], 128  }
  0xcd   :  { %151 = vsyncadd [#allocation3], 4294967168 }
  0xce   :  { %113 = vsyncpa [#allocation3], 1 }

// kernel: tpu_custom_call.1
= control target key start
LH: loop header
LB: loop body
LE: loop exit
PB: predicated region body
PF: predicated region fallthrough
CT: control target
= control target key end

     0   :  { %v152_v1 = vmov 0.0   ;;  %vm153_vm0 = vmmov 0   ;;  %s191_s0 = inlined_call_operand.vmem [shape: f32[16,8], index: 0, kind: input, shape index: {}]   ;;  %s192_s1 = inlined_call_operand.vmem [shape: f32[8,16], index: 1, kind: input, shape index: {}]   ;;  %s193_s2 = inlined_call_operand.vmem [shape: f32[8,1], index: 2, kind: input, shape index: {}]   ;;  %s194_s3 = inlined_call_operand.hbm [shape: f32[8,8], index: 3, kind: output, shape index: {}]  }
   0x1   :  { %v17_v0 = vld [vmem:[%s191_s0 + $0x8] sm:$0xff]  ;;  %118 = vmatprep.subr.mxu0 %v152_v1  ;;  %v16_v2 = vld [vmem:[%s191_s0] sm:$0xff]  ;;  %122 = vmatprep.mubr.msk.f32.mxu0 %vm153_vm0, %v152_v1 }
   0x2   :  { %v18_v3 = vld [vmem:[%s193_s2] sm:$0xff] }
   0x3   :  { %8 = vsyncpa [#allocation3], 0  ;;  %119 = vmatpush3.msra.mxu0 %v17_v0  ;;  %v15_v4 = vld [vmem:[%s192_s1] sm:$0xff]  ;;  %vm24_vm1 = vcmask 130048   ;;  %v154_v5 = vmov 0   ;;  %s155_s0 = smov [#allocation2]  }
   0x4   :  { %129 = vset.pattern.permute.xlu0 %v154_v5  ;;  %120 = vmatprep.subr.mxu0 %v152_v1  ;;  %s106_s20 = sshll.u32 %s155_s0, 4  ;;  %vm98_vm2 = vcmask 64512   ;;  %s107_s20 = int_to_ptr.vmem [resolvable:$true] %s106_s20 }
   0x5   :  { %21 = vperm.xlu0 %129, %v18_v3   ;;  %121 = vmatpush3.msra.mxu0 %v16_v2  ;;  %s130_s2 = scalar_lea.vmem %s107_s20, 128  ;;  %p135_p1 = scmp.lt.s32.totalorder %s107_s20, %s107_s20 }
   0x6   :  { %123 = vmatmul.mubr.msk.f32.vlgmr.msra.gmra.mxu0 %vm24_vm1, %v15_v4  ;;  %p131_p0 = scmp.ne.s32.totalorder %s107_s20, %s130_s2  ;;  %p136_p2 = scmp.lt.s32.totalorder %s130_s2, %s130_s2 }
   0x8   :  { %p137_p3 = por %p136_p2, %p135_p1 }
   0xa   :  { %p138_p4 = pnand %p137_p3, %p131_p0 }
  0x80   :  { %v22_v6 = vpop.permute.xlu0 %21 }
  0xc6   :  { %v94_v7 = vpop.f32.mrf.mxu0 }
  0xc7   :  { %v95_v8 = vadd.f32 %v94_v7, %v22_v6 }
  0xc8   :  { %v124_v9 = vpop.f32.mrf.mxu0 }
  0xc9   :  { %99 = vst.msk [vmem:[#allocation2] sm:$0xff] %vm98_vm2, %v95_v8 }
  0xca   :  { %141 = shalt.err (!%p138_p4)
}
  0xcb   :  { %109 = dma.vmem_to_hbm [thread:$0]  %s107_s20, 128, %s194_s3, [#allocation3]  }
  0xcc   :  { %150 = dma.done.wait [#allocation3], 128  }
  0xcd   :  { %151 = vsyncadd [#allocation3], 4294967168 }
  0xce   :  { %113 = vsyncpa [#allocation3], 1 }

</bundles_post_ra>
